<compile_context>
chip_gen: v7x
topology: tpu7x:2x2x1
jax: 0.10.0
libtpu: 0.0.40
codegen_flags: <defaults>
</compile_context>

<pallas_src>
import jax
import jax.numpy as jnp
from jax.experimental import pallas as pl
from jax.experimental.pallas import tpu as pltpu


def _scalar_identity_kernel(const_ref, out_ref):
    # The entire "forward pass": return the parameter.
    # SMEM in / SMEM out -> one scalar load + one scalar store, no grid.
    out_ref[0] = const_ref[0]


@jax.jit
def scalar_forward_pallas(constant_param: jax.Array) -> jax.Array:
    """Kernel-boundary version of Scalar.forward() (debug-only path).

    The zero-cost path is to return the parameter directly (see ScalarPallas).
    """
    const_1d = jnp.asarray(constant_param, dtype=jnp.float32).reshape(1)
    out = pl.pallas_call(
        _scalar_identity_kernel,
        out_shape=jax.ShapeDtypeStruct((1,), jnp.float32),
        in_specs=[pl.BlockSpec(memory_space=pltpu.SMEM)],
        out_specs=pl.BlockSpec(memory_space=pltpu.SMEM),
    )(const_1d)
    return out.reshape(())  # 0-d, matching the PyTorch 0-d Parameter


class ScalarPallas:
    """Mirror of the PyTorch `Scalar` module; parameter held as a JAX array."""

    def __init__(self, init_value: float):
        # Same init as torch.tensor(init_value, dtype=torch.float32).
        self.constant = jnp.asarray(init_value, dtype=jnp.float32)  # 0-d f32

    def __call__(self, use_kernel: bool = False) -> jax.Array:
        if use_kernel:
            # Explicit (debug-only) Pallas kernel boundary.
            return scalar_forward_pallas(self.constant)
        # Fast path (the only path training code should use): forward() is an
        # identity on the parameter; returning it directly costs nothing.
        return self.constant


if __name__ == "__main__":
    # Deterministic example "input": the init value for the parameter.
    key = jax.random.PRNGKey(0)
    init_value = float(jax.random.uniform(key, (), minval=-1.0, maxval=1.0))

    module = ScalarPallas(init_value)

    # Zero-overhead path (what real SAC training code should use).
    out_direct = module()
    # Pallas kernel path: run the kernel once and block on it.
    out_kernel = module(use_kernel=True)
    jax.block_until_ready(out_kernel)

    # Correctness checks against the trivial reference (return the parameter).
    assert out_kernel.shape == () and out_kernel.dtype == jnp.float32
    assert out_direct.shape == () and out_direct.dtype == jnp.float32
    assert jnp.allclose(out_kernel, jnp.float32(init_value))
    assert jnp.allclose(out_direct, out_kernel)

    print("KERNEL_OK")
</pallas_src>

<mosaic_0001>
module attributes {stable_mosaic.version = 11 : i64} {
  func.func @_scalar_identity_kernel(%arg0: memref<1xf32, #tpu.memory_space<smem>>, %arg1: memref<1xf32, #tpu.memory_space<smem>>) attributes {dimension_semantics = [], scalar_prefetch = 0 : i64, scratch_operands = 0 : i64, tpu.core_type = #tpu.core_type<tc>} {
    %c0 = arith.constant 0 : index
    %0 = memref.load %arg0[%c0] : memref<1xf32, #tpu.memory_space<smem>>
    %c0_0 = arith.constant 0 : index
    %1 = memref.load %arg1[%c0_0] : memref<1xf32, #tpu.memory_space<smem>>
    memref.store %0, %arg1[%c0_0] : memref<1xf32, #tpu.memory_space<smem>>
    return
  }
}

</mosaic_0001>

<bundles_post_ra>
// kernel: scalar_forward_pallas.1
= control target key start
LH: loop header
LB: loop body
LE: loop exit
PB: predicated region body
PF: predicated region fallthrough
CT: control target
= control target key end

     0   :  { %7 = vsyncpa [#allocation4], 0  ;;  %s65_s0 = inlined_call_operand.<no memory space> [shape: f32[1], index: 0, kind: input, shape index: {}]   ;;  %s66_s1 = inlined_call_operand.hbm [shape: f32[1], index: 1, kind: output, shape index: {}]  }
   0x1   :  { %12 = sst [smem:[#allocation3]] %s65_s0  ;;  %s27_s10 = scalar_lea.hbm %s66_s1, 16 }
   0x2   :  { %p28_p0 = scmp.ne.s32.totalorder %s66_s1, %s27_s10  ;;  %p31_p1 = scmp.lt.u32.totalorder %s27_s10, %s66_s1 }
   0x4   :  { %p33_p2 = pnand %p31_p1, %p28_p0 }
   0x6   :  { %36 = shalt.err (!%p33_p2)
}
   0x7   :  { %s39_s15 = smov [#allocation3]  }
   0x8   :  { %20 = dma.smem_to_hbm %s39_s15, 16, %s66_s1, [#allocation4]  }
   0x9   :  { %37 = dma.done.wait [#allocation4], 16  }
   0xa   :  { %38 = vsyncadd [#allocation4], 4294967280 }
   0xb   :  { %24 = sfence }
   0xc   :  { %25 = vsyncpa [#allocation4], 1 }

</bundles_post_ra>
